<compile_context>
chip_gen: v6e
topology: v6e:2x2x1
jax: 0.10.0
libtpu: 0.0.40
codegen_flags: <defaults>
</compile_context>

<pallas_src>
import jax
import jax.numpy as jnp
from jax.experimental import pallas as pl
from jax.experimental.pallas import tpu as pltpu


def _round_up(n, m):
    return ((n + m - 1) // m) * m


def _choose_tiling(B):
    """Returns (B_pad, bm). B_pad is a multiple of 128 (lane-dense transposed
    output) and of bm; bm is 512-1024 for big batches, with >=2 grid steps once
    the batch is large enough for v7x's two TensorCores to both get work."""
    if B <= 512:
        bp = _round_up(max(B, 128), 128)
        return bp, bp                      # single grid step
    bm = 1024 if B >= 2048 else 512
    return _round_up(B, bm), bm


# --------------------------------------------------------------------------
# Kernel
# --------------------------------------------------------------------------
def mlp_kernel(x_ref, w_ref, b_ref, out_ref):
    # x_ref: (bm, 80) bf16   w_ref: (5, 128, 128) bf16   b_ref: (5, 1, 128) f32
    # out_ref: (8, bm) f32   rows 0..5 = policy probs, row 6 = value, row 7 pad.

    # Layer 0: contract only the 80 real features (static ref slice is free).
    h = x_ref[...]                                             # (bm, 80) bf16
    z = jnp.dot(h, w_ref[0, :80, :],
                preferred_element_type=jnp.float32) + b_ref[0]
    h = jnp.maximum(z, 0.0).astype(jnp.bfloat16)               # (bm, 128) bf16

    # Layers 1..3: matmul (bf16 -> f32 acc) + bias + ReLU.
    for i in range(1, 4):
        z = jnp.dot(h, w_ref[i], preferred_element_type=jnp.float32) + b_ref[i]
        h = jnp.maximum(z, 0.0).astype(jnp.bfloat16)

    # Layer 4 (fused final layer): lanes 0..5 = policy logits, lane 6 = value.
    z = jnp.dot(h, w_ref[4], preferred_element_type=jnp.float32) + b_ref[4]

    # Transpose on the XLU and keep only the 8 useful rows -> lane-dense output
    # and 16x fewer exp/where/max ops in the epilogue.
    zT = jnp.transpose(z)[:8, :]                               # (8, bm) f32

    sub = jax.lax.broadcasted_iota(jnp.int32, zT.shape, 0)
    is_logit = sub < 6

    # Softmax over rows 0..5 only (rows 6..7 underflow to exp(-1e30) = 0).
    masked = jnp.where(is_logit, zT, jnp.float32(-1e30))
    m = jnp.max(masked, axis=0, keepdims=True)
    e = jnp.exp(masked - m)
    s = jnp.sum(e, axis=0, keepdims=True)
    probs = e / s                                              # exact normalization

    # Value head ends with ReLU in the original module.
    value = jnp.maximum(zT, 0.0)

    out_ref[...] = jnp.where(
        is_logit, probs, jnp.where(sub == 6, value, 0.0)
    ).astype(out_ref.dtype)


# --------------------------------------------------------------------------
# Parameter init (PyTorch nn.Linear layout: W=(out,in), b=(out,)) and packing
# --------------------------------------------------------------------------
def init_params(key):
    def linear(key, in_f, out_f, bias=True):
        kw, kb = jax.random.split(key)
        bound = 1.0 / jnp.sqrt(jnp.float32(in_f))
        w = jax.random.uniform(kw, (out_f, in_f), jnp.float32, -bound, bound)
        if bias:
            b = jax.random.uniform(kb, (out_f,), jnp.float32, -bound, bound)
            return w, b
        return (w,)

    keys = jax.random.split(key, 8)
    p = {}
    p["w1"], p["b1"] = linear(keys[0], 80, 80)
    p["w2"], p["b2"] = linear(keys[1], 80, 80)
    p["wv1"], p["bv1"] = linear(keys[2], 80, 40)
    p["wv2"], p["bv2"] = linear(keys[3], 40, 20)
    p["wv3"], p["bv3"] = linear(keys[4], 20, 1)
    p["wp1"], p["bp1"] = linear(keys[5], 80, 40)
    p["wp2"], p["bp2"] = linear(keys[6], 40, 20)
    (p["wp3"],) = linear(keys[7], 20, 6, bias=False)
    return p


def pack_params(raw):
    """Pack 8 Linear layers into one (5,128,128) bf16 weight slab + (5,1,128) f32 bias slab."""
    W = jnp.zeros((5, 128, 128), jnp.float32)
    W = W.at[0, :80, :80].set(raw["w1"].T)
    W = W.at[1, :80, :80].set(raw["w2"].T)
    # fused head layer 1: policy -> lanes 0..39, value -> lanes 40..79
    W = W.at[2, :80, 0:40].set(raw["wp1"].T)
    W = W.at[2, :80, 40:80].set(raw["wv1"].T)
    # fused head layer 2 (block-diagonal): policy -> lanes 0..19, value -> 20..39
    W = W.at[3, 0:40, 0:20].set(raw["wp2"].T)
    W = W.at[3, 40:80, 20:40].set(raw["wv2"].T)
    # fused head layer 3: logits -> lanes 0..5, value -> lane 6
    W = W.at[4, 0:20, 0:6].set(raw["wp3"].T)
    W = W.at[4, 20:40, 6:7].set(raw["wv3"].T)

    B = jnp.zeros((5, 1, 128), jnp.float32)
    B = B.at[0, 0, :80].set(raw["b1"])
    B = B.at[1, 0, :80].set(raw["b2"])
    B = B.at[2, 0, 0:40].set(raw["bp1"])
    B = B.at[2, 0, 40:80].set(raw["bv1"])
    B = B.at[3, 0, 0:20].set(raw["bp2"])
    B = B.at[3, 0, 20:40].set(raw["bv2"])
    B = B.at[4, 0, 6].set(raw["bv3"][0])          # policy final layer has no bias

    return W.astype(jnp.bfloat16), B


# --------------------------------------------------------------------------
# Wrapper
# --------------------------------------------------------------------------
def mlp_forward(x, packed):
    """x: (B, ...) with prod(...) == 80. Returns (action_probs (B,6), state_values (B,1))."""
    w_slab, b_slab = packed
    B = x.shape[0]
    x2 = x.reshape(B, -1)
    assert x2.shape[1] == 80, f"expected 80 flattened features, got {x2.shape[1]}"
    x2 = x2.astype(jnp.bfloat16)          # straight to bf16: no f32 round trip

    B_pad, bm = _choose_tiling(B)
    if B_pad != B:
        xp = jnp.zeros((B_pad, 80), jnp.bfloat16).at[:B].set(x2)
    else:
        xp = x2

    out = pl.pallas_call(
        mlp_kernel,
        out_shape=jax.ShapeDtypeStruct((8, B_pad), jnp.float32),
        grid_spec=pltpu.PrefetchScalarGridSpec(
            num_scalar_prefetch=0,
            grid=(B_pad // bm,),
            in_specs=[
                pl.BlockSpec((bm, 80), lambda i: (i, 0)),
                # Constant block index -> fetched once, kept resident across steps.
                pl.BlockSpec((5, 128, 128), lambda i: (0, 0, 0)),
                pl.BlockSpec((5, 1, 128), lambda i: (0, 0, 0)),
            ],
            out_specs=pl.BlockSpec((8, bm), lambda i: (0, i)),
        ),
        compiler_params=pltpu.CompilerParams(
            dimension_semantics=("parallel",)),
    )(xp, w_slab, b_slab)

    res = out[:, :B].T                    # (B, 8)
    probs = res[:, :6]
    values = res[:, 6:7]
    return probs, values


# --------------------------------------------------------------------------
# Pure-JAX reference (mirrors the kernel's bf16 matmul inputs / f32 accumulate)
# --------------------------------------------------------------------------
def mlp_reference(x, raw):
    bf16 = jnp.bfloat16

    def lin(h, w, b=None):
        z = jnp.dot(h.astype(bf16), w.T.astype(bf16),
                    preferred_element_type=jnp.float32)
        return z if b is None else z + b

    B = x.shape[0]
    h = x.reshape(B, -1).astype(jnp.float32)
    h = jnp.maximum(lin(h, raw["w1"], raw["b1"]), 0.0)
    h = jnp.maximum(lin(h, raw["w2"], raw["b2"]), 0.0)
    v = jnp.maximum(lin(h, raw["wv1"], raw["bv1"]), 0.0)
    v = jnp.maximum(lin(v, raw["wv2"], raw["bv2"]), 0.0)
    v = jnp.maximum(lin(v, raw["wv3"], raw["bv3"]), 0.0)
    p = jnp.maximum(lin(h, raw["wp1"], raw["bp1"]), 0.0)
    p = jnp.maximum(lin(p, raw["wp2"], raw["bp2"]), 0.0)
    logits = lin(p, raw["wp3"])
    probs = jax.nn.softmax(logits, axis=1)
    return probs, v


if __name__ == "__main__":
    key = jax.random.PRNGKey(0)
    k_params, k_x = jax.random.split(key)

    raw = init_params(k_params)
    packed = pack_params(raw)

    # Input: (batch=8, 4, 20) -> Flatten -> (8, 80)
    x = jax.random.normal(k_x, (8, 4, 20), jnp.float32)

    probs, values = mlp_forward(x, packed)
    probs, values = jax.block_until_ready((probs, values))

    ref_probs, ref_values = mlp_reference(x, raw)

    assert probs.shape == (8, 6) and values.shape == (8, 1)
    # bf16 matmul inputs -> relaxed (but still tight) tolerances.
    assert jnp.allclose(probs, ref_probs, atol=2e-3, rtol=2e-3)
    assert jnp.allclose(values, ref_values, atol=1e-3, rtol=1e-2)
    assert jnp.allclose(jnp.sum(probs, axis=1), 1.0, atol=5e-3)

    print("KERNEL_OK")
</pallas_src>

<mosaic_0001>
module attributes {stable_mosaic.version = 11 : i64} {
  func.func @mlp_kernel(%arg0: i32, %arg1: memref<128x80xbf16, #tpu.memory_space<vmem>>, %arg2: memref<5x128x128xbf16, #tpu.memory_space<vmem>>, %arg3: memref<5x1x128xf32, #tpu.memory_space<vmem>>, %arg4: memref<8x128xf32, #tpu.memory_space<vmem>>) attributes {dimension_semantics = [#tpu.dimension_semantics<parallel>], iteration_bounds = array<i64: 1>, scalar_prefetch = 0 : i64, scratch_operands = 0 : i64, tpu.core_type = #tpu.core_type<tc>, window_params = [{transform_indices = @transform_0, window_bounds = array<i64: 128, 80>}, {pipeline_mode = #tpu.pipeline_mode<synchronous>, transform_indices = @transform_1, window_bounds = array<i64: 5, 128, 128>}, {pipeline_mode = #tpu.pipeline_mode<synchronous>, transform_indices = @transform_2, window_bounds = array<i64: 5, 1, 128>}, {transform_indices = @transform_3, window_bounds = array<i64: 8, 128>}]} {
    %c0 = arith.constant 0 : index
    %c0_0 = arith.constant 0 : index
    %0 = vector.load %arg1[%c0, %c0_0] : memref<128x80xbf16, #tpu.memory_space<vmem>>, vector<128x80xbf16>
    %c0_1 = arith.constant 0 : index
    %c0_2 = arith.constant 0 : index
    %c0_3 = arith.constant 0 : index
    %1 = vector.load %arg2[%c0_1, %c0_2, %c0_3] : memref<5x128x128xbf16, #tpu.memory_space<vmem>>, vector<1x80x128xbf16>
    %2 = vector.shape_cast %1 : vector<1x80x128xbf16> to vector<80x128xbf16>
    %cst = arith.constant dense<0.000000e+00> : vector<128x128xf32>
    %3 = tpu.matmul %0, %2, %cst {dimension_numbers = #tpu.dot_dimension_numbers<[1], [0], [0], [1], [0, 0, 1, 1], [], []>} : vector<128x80xbf16>, vector<80x128xbf16>, vector<128x128xf32> -> vector<128x128xf32>
    %c0_4 = arith.constant 0 : index
    %c0_5 = arith.constant 0 : index
    %c0_6 = arith.constant 0 : index
    %4 = vector.load %arg3[%c0_4, %c0_5, %c0_6] : memref<5x1x128xf32, #tpu.memory_space<vmem>>, vector<1x1x128xf32>
    %5 = vector.shape_cast %4 : vector<1x1x128xf32> to vector<1x128xf32>
    %6 = vector.broadcast %5 : vector<1x128xf32> to vector<128x128xf32>
    %7 = arith.addf %3, %6 : vector<128x128xf32>
    %cst_7 = arith.constant 0.000000e+00 : f32
    %8 = vector.broadcast %cst_7 : f32 to vector<128x128xf32>
    %9 = arith.maximumf %7, %8 : vector<128x128xf32>
    %10 = arith.truncf %9 : vector<128x128xf32> to vector<128x128xbf16>
    %c1 = arith.constant 1 : index
    %c0_8 = arith.constant 0 : index
    %c0_9 = arith.constant 0 : index
    %11 = vector.load %arg2[%c1, %c0_8, %c0_9] : memref<5x128x128xbf16, #tpu.memory_space<vmem>>, vector<1x128x128xbf16>
    %12 = vector.shape_cast %11 : vector<1x128x128xbf16> to vector<128x128xbf16>
    %cst_10 = arith.constant dense<0.000000e+00> : vector<128x128xf32>
    %13 = tpu.matmul %10, %12, %cst_10 {dimension_numbers = #tpu.dot_dimension_numbers<[1], [0], [0], [1], [0, 0, 1, 1], [], []>} : vector<128x128xbf16>, vector<128x128xbf16>, vector<128x128xf32> -> vector<128x128xf32>
    %c1_11 = arith.constant 1 : index
    %c0_12 = arith.constant 0 : index
    %c0_13 = arith.constant 0 : index
    %14 = vector.load %arg3[%c1_11, %c0_12, %c0_13] : memref<5x1x128xf32, #tpu.memory_space<vmem>>, vector<1x1x128xf32>
    %15 = vector.shape_cast %14 : vector<1x1x128xf32> to vector<1x128xf32>
    %16 = vector.broadcast %15 : vector<1x128xf32> to vector<128x128xf32>
    %17 = arith.addf %13, %16 : vector<128x128xf32>
    %cst_14 = arith.constant 0.000000e+00 : f32
    %18 = vector.broadcast %cst_14 : f32 to vector<128x128xf32>
    %19 = arith.maximumf %17, %18 : vector<128x128xf32>
    %20 = arith.truncf %19 : vector<128x128xf32> to vector<128x128xbf16>
    %c2 = arith.constant 2 : index
    %c0_15 = arith.constant 0 : index
    %c0_16 = arith.constant 0 : index
    %21 = vector.load %arg2[%c2, %c0_15, %c0_16] : memref<5x128x128xbf16, #tpu.memory_space<vmem>>, vector<1x128x128xbf16>
    %22 = vector.shape_cast %21 : vector<1x128x128xbf16> to vector<128x128xbf16>
    %cst_17 = arith.constant dense<0.000000e+00> : vector<128x128xf32>
    %23 = tpu.matmul %20, %22, %cst_17 {dimension_numbers = #tpu.dot_dimension_numbers<[1], [0], [0], [1], [0, 0, 1, 1], [], []>} : vector<128x128xbf16>, vector<128x128xbf16>, vector<128x128xf32> -> vector<128x128xf32>
    %c2_18 = arith.constant 2 : index
    %c0_19 = arith.constant 0 : index
    %c0_20 = arith.constant 0 : index
    %24 = vector.load %arg3[%c2_18, %c0_19, %c0_20] : memref<5x1x128xf32, #tpu.memory_space<vmem>>, vector<1x1x128xf32>
    %25 = vector.shape_cast %24 : vector<1x1x128xf32> to vector<1x128xf32>
    %26 = vector.broadcast %25 : vector<1x128xf32> to vector<128x128xf32>
    %27 = arith.addf %23, %26 : vector<128x128xf32>
    %cst_21 = arith.constant 0.000000e+00 : f32
    %28 = vector.broadcast %cst_21 : f32 to vector<128x128xf32>
    %29 = arith.maximumf %27, %28 : vector<128x128xf32>
    %30 = arith.truncf %29 : vector<128x128xf32> to vector<128x128xbf16>
    %c3 = arith.constant 3 : index
    %c0_22 = arith.constant 0 : index
    %c0_23 = arith.constant 0 : index
    %31 = vector.load %arg2[%c3, %c0_22, %c0_23] : memref<5x128x128xbf16, #tpu.memory_space<vmem>>, vector<1x128x128xbf16>
    %32 = vector.shape_cast %31 : vector<1x128x128xbf16> to vector<128x128xbf16>
    %cst_24 = arith.constant dense<0.000000e+00> : vector<128x128xf32>
    %33 = tpu.matmul %30, %32, %cst_24 {dimension_numbers = #tpu.dot_dimension_numbers<[1], [0], [0], [1], [0, 0, 1, 1], [], []>} : vector<128x128xbf16>, vector<128x128xbf16>, vector<128x128xf32> -> vector<128x128xf32>
    %c3_25 = arith.constant 3 : index
    %c0_26 = arith.constant 0 : index
    %c0_27 = arith.constant 0 : index
    %34 = vector.load %arg3[%c3_25, %c0_26, %c0_27] : memref<5x1x128xf32, #tpu.memory_space<vmem>>, vector<1x1x128xf32>
    %35 = vector.shape_cast %34 : vector<1x1x128xf32> to vector<1x128xf32>
    %36 = vector.broadcast %35 : vector<1x128xf32> to vector<128x128xf32>
    %37 = arith.addf %33, %36 : vector<128x128xf32>
    %cst_28 = arith.constant 0.000000e+00 : f32
    %38 = vector.broadcast %cst_28 : f32 to vector<128x128xf32>
    %39 = arith.maximumf %37, %38 : vector<128x128xf32>
    %40 = arith.truncf %39 : vector<128x128xf32> to vector<128x128xbf16>
    %c4 = arith.constant 4 : index
    %c0_29 = arith.constant 0 : index
    %c0_30 = arith.constant 0 : index
    %41 = vector.load %arg2[%c4, %c0_29, %c0_30] : memref<5x128x128xbf16, #tpu.memory_space<vmem>>, vector<1x128x128xbf16>
    %42 = vector.shape_cast %41 : vector<1x128x128xbf16> to vector<128x128xbf16>
    %cst_31 = arith.constant dense<0.000000e+00> : vector<128x128xf32>
    %43 = tpu.matmul %40, %42, %cst_31 {dimension_numbers = #tpu.dot_dimension_numbers<[1], [0], [0], [1], [0, 0, 1, 1], [], []>} : vector<128x128xbf16>, vector<128x128xbf16>, vector<128x128xf32> -> vector<128x128xf32>
    %c4_32 = arith.constant 4 : index
    %c0_33 = arith.constant 0 : index
    %c0_34 = arith.constant 0 : index
    %44 = vector.load %arg3[%c4_32, %c0_33, %c0_34] : memref<5x1x128xf32, #tpu.memory_space<vmem>>, vector<1x1x128xf32>
    %45 = vector.shape_cast %44 : vector<1x1x128xf32> to vector<1x128xf32>
    %46 = vector.broadcast %45 : vector<1x128xf32> to vector<128x128xf32>
    %47 = arith.addf %43, %46 : vector<128x128xf32>
    %48 = tpu.transpose %47, [1, 0] : vector<128x128xf32> -> vector<128x128xf32>
    %49 = vector.extract_strided_slice %48 {offsets = [0, 0], sizes = [8, 128], strides = [1, 1]} : vector<128x128xf32> to vector<8x128xf32>
    %50 = tpu.iota {dimensions = array<i32: 0>} : vector<8x128xi32>
    %c6_i32 = arith.constant 6 : i32
    %51 = vector.broadcast %c6_i32 : i32 to vector<8x128xi32>
    %52 = arith.cmpi slt, %50, %51 : vector<8x128xi32>
    %cst_35 = arith.constant -1.000000e+30 : f32
    %53 = vector.broadcast %cst_35 : f32 to vector<8x128xf32>
    %54 = arith.select %52, %49, %53 : vector<8x128xi1>, vector<8x128xf32>
    %cst_36 = arith.constant dense<0xFF800000> : vector<128xf32>
    %55 = vector.multi_reduction <maximumf>, %54, %cst_36 [0] : vector<8x128xf32> to vector<128xf32>
    %56 = vector.shape_cast %55 : vector<128xf32> to vector<1x128xf32>
    %57 = vector.broadcast %56 : vector<1x128xf32> to vector<8x128xf32>
    %58 = arith.subf %54, %57 : vector<8x128xf32>
    %59 = math.exp %58 : vector<8x128xf32>
    %cst_37 = arith.constant dense<0.000000e+00> : vector<128xf32>
    %60 = vector.multi_reduction <add>, %59, %cst_37 [0] : vector<8x128xf32> to vector<128xf32>
    %61 = vector.shape_cast %60 : vector<128xf32> to vector<1x128xf32>
    %62 = vector.broadcast %61 : vector<1x128xf32> to vector<8x128xf32>
    %63 = arith.divf %59, %62 : vector<8x128xf32>
    %cst_38 = arith.constant 0.000000e+00 : f32
    %64 = vector.broadcast %cst_38 : f32 to vector<8x128xf32>
    %65 = arith.maximumf %49, %64 : vector<8x128xf32>
    %c6_i32_39 = arith.constant 6 : i32
    %66 = vector.broadcast %c6_i32_39 : i32 to vector<8x128xi32>
    %67 = arith.cmpi eq, %50, %66 : vector<8x128xi32>
    %cst_40 = arith.constant 0.000000e+00 : f32
    %68 = vector.broadcast %cst_40 : f32 to vector<8x128xf32>
    %69 = arith.select %67, %65, %68 : vector<8x128xi1>, vector<8x128xf32>
    %70 = arith.select %52, %63, %69 : vector<8x128xi1>, vector<8x128xf32>
    %c0_41 = arith.constant 0 : index
    %c0_42 = arith.constant 0 : index
    %71 = vector.load %arg4[%c0_41, %c0_42] : memref<8x128xf32, #tpu.memory_space<vmem>>, vector<8x128xf32>
    tpu.vector_store %arg4[%c0_41, %c0_42], %70 {strides = array<i32>} : memref<8x128xf32, #tpu.memory_space<vmem>>, vector<8x128xf32>,
    return
  }
  func.func @transform_0(%arg0: i32) -> (i32, i32) {
    %c0_i32 = arith.constant 0 : i32
    %c0_i32_0 = arith.constant 0 : i32
    return %arg0, %c0_i32 : i32, i32
  }
  func.func @transform_1(%arg0: i32) -> (i32, i32, i32) {
    %c0_i32 = arith.constant 0 : i32
    %c0_i32_0 = arith.constant 0 : i32
    %c0_i32_1 = arith.constant 0 : i32
    %c0_i32_2 = arith.constant 0 : i32
    return %c0_i32, %c0_i32_0, %c0_i32_1 : i32, i32, i32
  }
  func.func @transform_2(%arg0: i32) -> (i32, i32, i32) {
    %c0_i32 = arith.constant 0 : i32
    %c0_i32_0 = arith.constant 0 : i32
    %c0_i32_1 = arith.constant 0 : i32
    %c0_i32_2 = arith.constant 0 : i32
    return %c0_i32, %c0_i32_0, %c0_i32_1 : i32, i32, i32
  }
  func.func @transform_3(%arg0: i32) -> (i32, i32) {
    %c0_i32 = arith.constant 0 : i32
    %c0_i32_0 = arith.constant 0 : i32
    return %c0_i32, %arg0 : i32, i32
  }
}

</mosaic_0001>

<bundles_post_ra>
// kernel: tpu_custom_call.1
= control target key start
LH: loop header
LB: loop body
LE: loop exit
PB: predicated region body
PF: predicated region fallthrough
CT: control target
= control target key end

     0   :  { %8 = vsyncpa [#allocation3], 0  ;;  %s1619_s0 = inlined_call_operand.vmem [shape: bf16[128,80], index: 0, kind: input, shape index: {}]   ;;  %s1620_s1 = inlined_call_operand.hbm [shape: bf16[5,128,128], index: 1, kind: input, shape index: {}]   ;;  %s1621_s2 = inlined_call_operand.vmem [shape: f32[5,1,128], index: 2, kind: input, shape index: {}]   ;;  %s1622_s3 = inlined_call_operand.hbm [shape: f32[8,128], index: 3, kind: output, shape index: {}]  }
   0x1   :  { %9 = vsyncpa [#allocation4], 0  ;;  %s1510_s12 = smov [#allocation2]  }
   0x2   :  { %s17_s13 = sshll.u32 %s1510_s12, 4  ;;  %s18_s13 = int_to_ptr.vmem [resolvable:$true] %s17_s13 }
   0x3   :  { %s1474_s14 = scalar_lea.vmem %s18_s13, 5120  ;;  %p1479_p1 = scmp.lt.s32.totalorder %s18_s13, %s18_s13 }
   0x4   :  { %p1475_p0 = scmp.ne.s32.totalorder %s18_s13, %s1474_s14  ;;  %p1480_p2 = scmp.lt.s32.totalorder %s1474_s14, %s1474_s14 }
   0x6   :  { %p1481_p3 = por %p1480_p2, %p1479_p1 }
   0x8   :  { %p1482_p4 = pnand %p1481_p3, %p1475_p0 }
   0xa   :  { %1485 = shalt.err (!%p1482_p4)
}
   0xb   :  { %s1511_s15 = smov 64   ;;  %s1512_s16 = smov 4  }
   0xc   :  { %23 = dma.hbm_to_vmem [thread:$0]  %s1620_s1, 5120, %s18_s13, [#allocation3], %s1511_s15, %s1511_s15, %s1512_s16  }
   0xd   :  { %1506 = dma.done.wait [#allocation3], 5120  }
   0xe   :  { %1507 = vsyncadd [#allocation3], 4294962176  ;;  %v1417_v0 = vld [vmem:[#allocation2 + $0x20] sm:$0xff]   ;;  %v1418_v1 = vld [vmem:[#allocation2 + $0x18] sm:$0xff]   ;;  %vm133_vm0 = vcmask 654336  }
   0xf   :  { %1243 = vmatprep.subr.bf16.mxu0 %v1417_v0  ;;  %v1419_v2 = vld [vmem:[#allocation2 + $0x10] sm:$0xff]   ;;  %v1422_v3 = vld [vmem:[%s1619_s0] sm:$0xff]   ;;  %v1420_v4 = vld [vmem:[#allocation2 + $0x8] sm:$0xff]  }
  0x10   :  { %1244 = vmatpush3.bf16.msra.mxu0 %v1417_v0  ;;  %1253 = vmatprep.mubr.msk.bf16.mxu0 %vm133_vm0, %v1422_v3  ;;  %v1421_v5 = vld [vmem:[#allocation2] sm:$0xff]   ;;  %v1430_v6 = vld [vmem:[#allocation2 + $0x78] sm:$0xff]   ;;  %v1431_v7 = vld [vmem:[#allocation2 + $0x70] sm:$0xff]  }
  0x11   :  { %1245 = vmatprep.subr.bf16.mxu0 %v1418_v1  ;;  %1269 = vmatprep.subr.bf16.mxu1 %v1430_v6  ;;  %v1423_v8 = vld [vmem:[%s1619_s0 + $0x8] sm:$0xff]   ;;  %v1424_v9 = vld [vmem:[%s1619_s0 + $0x10] sm:$0xff]   ;;  %v1433_v11 = vld [vmem:[#allocation2 + $0x60] sm:$0xff]  }
  0x12   :  { %1270 = vmatpush3.bf16.msra.mxu1 %v1430_v6  ;;  %v1432_v10 = vld [vmem:[#allocation2 + $0x68] sm:$0xff]   ;;  %v1434_v12 = vld [vmem:[#allocation2 + $0x58] sm:$0xff]   ;;  %v1426_v14 = vld [vmem:[%s1619_s0 + $0x20] sm:$0xff]  }
  0x13   :  { %1271 = vmatprep.subr.bf16.mxu1 %v1431_v7  ;;  %v1425_v13 = vld [vmem:[%s1619_s0 + $0x18] sm:$0xff]   ;;  %v1427_v15 = vld [vmem:[%s1619_s0 + $0x28] sm:$0xff]   ;;  %v1428_v16 = vld [vmem:[%s1619_s0 + $0x30] sm:$0xff]  }
  0x14   :  { %1246 = vmatpush3.bf16.msra.mxu0 %v1418_v1  ;;  %v1429_v17 = vld [vmem:[%s1619_s0 + $0x38] sm:$0xff]   ;;  %v1435_v18 = vld [vmem:[#allocation2 + $0x50] sm:$0xff]   ;;  %v1436_v19 = vld [vmem:[#allocation2 + $0x48] sm:$0xff]  }
  0x15   :  { %1247 = vmatprep.subr.bf16.mxu0 %v1419_v2  ;;  %v1437_v20 = vld [vmem:[#allocation2 + $0x40] sm:$0xff]   ;;  %v1438_v21 = vld [vmem:[#allocation2 + $0xb8] sm:$0xff]   ;;  %v1439_v22 = vld [vmem:[#allocation2 + $0xb0] sm:$0xff]  }
  0x16   :  { %1272 = vmatpush3.bf16.msra.mxu1 %v1431_v7  ;;  %v1440_v23 = vld [vmem:[#allocation2 + $0xa8] sm:$0xff]   ;;  %v1441_v24 = vld [vmem:[#allocation2 + $0xa0] sm:$0xff]   ;;  %v1442_v25 = vld [vmem:[#allocation2 + $0x98] sm:$0xff]  }
  0x17   :  { %1273 = vmatprep.subr.bf16.mxu1 %v1432_v10  ;;  %v1104_v28 = vld [vmem:[%s1621_s2] ss:$0 sm:$0xff] }
  0x18   :  { %1248 = vmatpush3.bf16.msra.mxu0 %v1419_v2 }
  0x19   :  { %1249 = vmatprep.subr.bf16.mxu0 %v1420_v4 }
  0x1a   :  { %1274 = vmatpush3.bf16.msra.mxu1 %v1432_v10 }
  0x1b   :  { %1275 = vmatprep.subr.bf16.mxu1 %v1433_v11 }
  0x1c   :  { %1250 = vmatpush3.bf16.msra.mxu0 %v1420_v4 }
  0x1d   :  { %1251 = vmatprep.subr.bf16.mxu0 %v1421_v5 }
  0x1e   :  { %1276 = vmatpush3.bf16.msra.mxu1 %v1433_v11 }
  0x1f   :  { %1277 = vmatprep.subr.bf16.mxu1 %v1434_v12 }
  0x20   :  { %1252 = vmatpush3.bf16.msra.mxu0 %v1421_v5 }
  0x21   :  { %1301 = vmatprep.subr.bf16.mxu0 %v1438_v21 }
  0x22   :  { %1278 = vmatpush3.bf16.msra.mxu1 %v1434_v12 }
  0x23   :  { %1254 = vmatmul.mubr.msk.bf16.vlgmr.msra.gmra.mxu0 %vm133_vm0, %v1423_v8  ;;  %1279 = vmatprep.subr.bf16.mxu1 %v1435_v18 }
  0x24   :  { %1257 = vmatprep.mubr.msk.bf16.mxu0 %vm133_vm0, %v1424_v9  ;;  %1302 = vmatpush3.bf16.msra.mxu0 %v1438_v21  ;;  %v1445_v21 = vld [vmem:[#allocation2 + $0x80] sm:$0xff]  }
  0x25   :  { %1303 = vmatprep.subr.bf16.mxu0 %v1439_v22 }
  0x26   :  { %1280 = vmatpush3.bf16.msra.mxu1 %v1435_v18 }
  0x27   :  { %1281 = vmatprep.subr.bf16.mxu1 %v1436_v19 }
  0x28   :  { %1304 = vmatpush3.bf16.msra.mxu0 %v1439_v22  ;;  %v1446_v22 = vld [vmem:[#allocation2 + $0xf8] sm:$0xff]  }
  0x29   :  { %1305 = vmatprep.subr.bf16.mxu0 %v1440_v23 }
  0x2a   :  { %1282 = vmatpush3.bf16.msra.mxu1 %v1436_v19  ;;  %v1443_v19 = vld [vmem:[#allocation2 + $0x90] sm:$0xff]  }
  0x2b   :  { %1258 = vmatmul.mubr.msk.bf16.gmra.mxu0 %vm133_vm0, %v1425_v13  ;;  %1283 = vmatprep.subr.bf16.mxu1 %v1437_v20 }
  0x2c   :  { %1261 = vmatprep.mubr.msk.bf16.mxu0 %vm133_vm0, %v1426_v14  ;;  %1306 = vmatpush3.bf16.msra.mxu0 %v1440_v23  ;;  %v1447_v23 = vld [vmem:[#allocation2 + $0xf0] sm:$0xff]  }
  0x2d   :  { %1307 = vmatprep.subr.bf16.mxu0 %v1441_v24 }
  0x2e   :  { %1284 = vmatpush3.bf16.msra.mxu1 %v1437_v20  ;;  %v1444_v20 = vld [vmem:[#allocation2 + $0x88] sm:$0xff]  }
  0x2f   :  { %1333 = vmatprep.subr.bf16.mxu1 %v1446_v22 }
  0x30   :  { %1308 = vmatpush3.bf16.msra.mxu0 %v1441_v24  ;;  %v1448_v24 = vld [vmem:[#allocation2 + $0xe8] sm:$0xff]  }
  0x31   :  { %1309 = vmatprep.subr.bf16.mxu0 %v1442_v25 }
  0x33   :  { %1262 = vmatmul.mubr.msk.bf16.gmra.mxu0 %vm133_vm0, %v1427_v15 }
  0x34   :  { %1265 = vmatprep.mubr.msk.bf16.mxu0 %vm133_vm0, %v1428_v16  ;;  %1310 = vmatpush3.bf16.msra.mxu0 %v1442_v25  ;;  %v1449_v25 = vld [vmem:[#allocation2 + $0xe0] sm:$0xff]  }
  0x35   :  { %1311 = vmatprep.subr.bf16.mxu0 %v1443_v19 }
  0x38   :  { %1312 = vmatpush3.bf16.msra.mxu0 %v1443_v19 }
  0x39   :  { %1313 = vmatprep.subr.bf16.mxu0 %v1444_v20 }
  0x3b   :  { %1266 = vmatmul.mubr.msk.bf16.gmra.mxu0 %vm133_vm0, %v1429_v17 }
  0x3c   :  { %1314 = vmatpush3.bf16.msra.mxu0 %v1444_v20  ;;  %v1451_v20 = vld [vmem:[#allocation2 + $0xd0] sm:$0xff]  }
  0x3d   :  { %1315 = vmatprep.subr.bf16.mxu0 %v1445_v21 }
  0x40   :  { %1316 = vmatpush3.bf16.msra.mxu0 %v1445_v21  ;;  %v1452_v21 = vld [vmem:[#allocation2 + $0xc8] sm:$0xff]  }
  0xe3   :  { %v1255_v26 = vpop.f32.mrf.mxu0 }
  0xe4   :  { %v201_v32 = vadd.f32 %v1255_v26, %v1104_v28  ;;  %v1450_v26 = vld [vmem:[#allocation2 + $0xd8] sm:$0xff]  }
  0xe5   :  { %v192_v27 = vpop.f32.mrf.mxu0 }
  0xe6   :  { %v193_v30 = vadd.f32 %v1104_v28, %v192_v27  ;;  %v257_v39 = vmax.f32 %v201_v32, 0.0 }
  0xe7   :  { %v1256_v29 = vpop.f32.mrf.mxu0 }
  0xe8   :  { %v204_v31 = vadd.f32 %v1256_v29, %v1104_v28  ;;  %v255_v37 = vmax.f32 %v193_v30, 0.0  ;;  %v1127_v29 = vld [vmem:[%s1621_s2 + $0x1] ss:$0 sm:$0xff] }
  0xe9   :  { %v195_v33 = vpop.f32.mrf.mxu0 }
  0xea   :  { %v196_v34 = vadd.f32 %v1104_v28, %v195_v33  ;;  %v258_v35 = vmax.f32 %v204_v31, 0.0 }
  0xeb   :  { %v1259_v36 = vpop.f32.mrf.mxu0 }
  0xec   :  { %v256_v38 = vmax.f32 %v196_v34, 0.0  ;;  %v217_v40 = vadd.f32 %v1259_v36, %v1104_v28  ;;  %v272_v44 = vpack.c.bf16 %v258_v35, %v257_v39 }
  0xed   :  { %v208_v41 = vpop.f32.mrf.mxu0 }
  0xee   :  { %v209_v42 = vadd.f32 %v1104_v28, %v208_v41  ;;  %v271_v43 = vpack.c.bf16 %v256_v38, %v255_v37  ;;  %v261_v47 = vmax.f32 %v217_v40, 0.0 }
  0xef   :  { %v1260_v45 = vpop.f32.mrf.mxu0 }
  0xf0   :  { %v220_v46 = vadd.f32 %v1260_v45, %v1104_v28  ;;  %1285 = vmatprep.mubr.bf16.mxu1 %v271_v43  ;;  %v259_v49 = vmax.f32 %v209_v42, 0.0 }
  0xf1   :  { %v211_v48 = vpop.f32.mrf.mxu0  ;;  %1286 = vmatmul.mubr.bf16.vlgmr.msra.gmra.mxu1 %v272_v44 }
  0xf2   :  { %v262_v50 = vmax.f32 %v220_v46, 0.0  ;;  %v212_v51 = vadd.f32 %v1104_v28, %v211_v48  ;;  %1334 = vmatpush3.bf16.msra.mxu1 %v1446_v22  ;;  %v1453_v22 = vld [vmem:[#allocation2 + $0xc0] sm:$0xff]  }
  0xf3   :  { %v1263_v52 = vpop.f32.mrf.mxu0  ;;  %1335 = vmatprep.subr.bf16.mxu1 %v1447_v23 }
  0xf4   :  { %v260_v53 = vmax.f32 %v212_v51, 0.0  ;;  %v274_v54 = vpack.c.bf16 %v262_v50, %v261_v47  ;;  %v233_v55 = vadd.f32 %v1263_v52, %v1104_v28 }
  0xf5   :  { %v224_v56 = vpop.f32.mrf.mxu0 }
  0xf6   :  { %v273_v57 = vpack.c.bf16 %v260_v53, %v259_v49  ;;  %v225_v58 = vadd.f32 %v1104_v28, %v224_v56  ;;  %v265_v61 = vmax.f32 %v233_v55, 0.0  ;;  %1336 = vmatpush3.bf16.msra.mxu1 %v1447_v23  ;;  %v1454_v23 = vld [vmem:[#allocation2 + $0x138] sm:$0xff]  }
  0xf7   :  { %v1264_v59 = vpop.f32.mrf.mxu0  ;;  %1337 = vmatprep.subr.bf16.mxu1 %v1448_v24  ;;  %1365 = vmatprep.subr.bf16.mxu0 %v1454_v23 }
  0xf8   :  { %v236_v60 = vadd.f32 %v1264_v59, %v1104_v28  ;;  %1289 = vmatprep.mubr.bf16.mxu1 %v273_v57  ;;  %v263_v63 = vmax.f32 %v225_v58, 0.0 }
  0xf9   :  { %v227_v62 = vpop.f32.mrf.mxu0  ;;  %1290 = vmatmul.mubr.bf16.gmra.mxu1 %v274_v54 }
  0xfa   :  { %v266_v0 = vmax.f32 %v236_v60, 0.0  ;;  %v228_v1 = vadd.f32 %v1104_v28, %v227_v62  ;;  %1338 = vmatpush3.bf16.msra.mxu1 %v1448_v24  ;;  %v1455_v24 = vld [vmem:[#allocation2 + $0x130] sm:$0xff]  }
  0xfb   :  { %v1267_v2 = vpop.f32.mrf.mxu0  ;;  %1339 = vmatprep.subr.bf16.mxu1 %v1449_v25 }
  0xfc   :  { %v264_v3 = vmax.f32 %v228_v1, 0.0  ;;  %v276_v4 = vpack.c.bf16 %v266_v0, %v265_v61  ;;  %v249_v5 = vadd.f32 %v1267_v2, %v1104_v28 }
  0xfd   :  { %v240_v6 = vpop.f32.mrf.mxu0 }
  0xfe   :  { %v275_v7 = vpack.c.bf16 %v264_v3, %v263_v63  ;;  %v241_v8 = vadd.f32 %v1104_v28, %v240_v6  ;;  %v269_v11 = vmax.f32 %v249_v5, 0.0  ;;  %1340 = vmatpush3.bf16.msra.mxu1 %v1449_v25  ;;  %v1456_v25 = vld [vmem:[#allocation2 + $0x128] sm:$0xff]  }
  0xff   :  { %v1268_v9 = vpop.f32.mrf.mxu0  ;;  %1341 = vmatprep.subr.bf16.mxu1 %v1450_v26 }
 0x100   :  { %v252_v10 = vadd.f32 %v1268_v9, %v1104_v28  ;;  %1293 = vmatprep.mubr.bf16.mxu1 %v275_v7  ;;  %v267_v13 = vmax.f32 %v241_v8, 0.0 }
 0x101   :  { %v243_v12 = vpop.f32.mrf.mxu0  ;;  %1294 = vmatmul.mubr.bf16.gmra.mxu1 %v276_v4 }
 0x102   :  { %v270_v14 = vmax.f32 %v252_v10, 0.0  ;;  %v244_v15 = vadd.f32 %v1104_v28, %v243_v12  ;;  %1342 = vmatpush3.bf16.msra.mxu1 %v1450_v26  ;;  %v1575_v26 = vld [vmem:[#allocation2 + $0x120] sm:$0xff]  }
 0x103   :  { %1343 = vmatprep.subr.bf16.mxu1 %v1451_v20 }
 0x104   :  { %v268_v16 = vmax.f32 %v244_v15, 0.0  ;;  %v278_v17 = vpack.c.bf16 %v270_v14, %v269_v11 }
 0x106   :  { %v277_v18 = vpack.c.bf16 %v268_v16, %v267_v13  ;;  %1344 = vmatpush3.bf16.msra.mxu1 %v1451_v20 }
 0x107   :  { %1345 = vmatprep.subr.bf16.mxu1 %v1452_v21 }
 0x108   :  { %1297 = vmatprep.mubr.bf16.mxu1 %v277_v18 }
 0x109   :  { %1298 = vmatmul.mubr.bf16.gmra.mxu1 %v278_v17 }
 0x10a   :  { %1346 = vmatpush3.bf16.msra.mxu1 %v1452_v21  ;;  %v1459_v21 = vld [vmem:[#allocation2 + $0x110] sm:$0xff]  }
 0x10b   :  { %1347 = vmatprep.subr.bf16.mxu1 %v1453_v22 }
 0x10e   :  { %1348 = vmatpush3.bf16.msra.mxu1 %v1453_v22  ;;  %v1460_v22 = vld [vmem:[#allocation2 + $0x108] sm:$0xff]  }
 0x10f   :  { %1397 = vmatprep.subr.bf16.mxu1 %v1454_v23 }
 0x1b1   :  { %v1287_v27 = vpop.f32.mrf.mxu1 }
 0x1b2   :  { %v395_v33 = vadd.f32 %v1287_v27, %v1127_v29  ;;  %v1578_v27 = vld [vmem:[#allocation2 + $0x118] sm:$0xff]  }
 0x1b3   :  { %v386_v28 = vpop.f32.mrf.mxu1 }
 0x1b4   :  { %v387_v31 = vadd.f32 %v1127_v29, %v386_v28  ;;  %v451_v40 = vmax.f32 %v395_v33, 0.0 }
 0x1b5   :  { %v1288_v30 = vpop.f32.mrf.mxu1 }
 0x1b6   :  { %v398_v32 = vadd.f32 %v1288_v30, %v1127_v29  ;;  %v449_v38 = vmax.f32 %v387_v31, 0.0  ;;  %v1586_v30 = vld [vmem:[%s1621_s2 + $0x2] ss:$0 sm:$0xff] }
 0x1b7   :  { %v389_v34 = vpop.f32.mrf.mxu1 }
 0x1b8   :  { %v390_v35 = vadd.f32 %v1127_v29, %v389_v34  ;;  %v452_v36 = vmax.f32 %v398_v32, 0.0 }
 0x1b9   :  { %v1291_v37 = vpop.f32.mrf.mxu1 }
 0x1ba   :  { %v450_v39 = vmax.f32 %v390_v35, 0.0  ;;  %v466_v43 = vpack.c.bf16 %v452_v36, %v451_v40  ;;  %v411_v47 = vadd.f32 %v1291_v37, %v1127_v29 }
 0x1bb   :  { %v402_v41 = vpop.f32.mrf.mxu1 }
 0x1bc   :  { %v465_v42 = vpack.c.bf16 %v450_v39, %v449_v38  ;;  %v403_v45 = vadd.f32 %v1127_v29, %v402_v41  ;;  %v455_v54 = vmax.f32 %v411_v47, 0.0 }
 0x1bd   :  { %v1292_v44 = vpop.f32.mrf.mxu1 }
 0x1be   :  { %v414_v46 = vadd.f32 %v1292_v44, %v1127_v29  ;;  %1317 = vmatprep.mubr.bf16.mxu0 %v465_v42  ;;  %v453_v52 = vmax.f32 %v403_v45, 0.0 }
 0x1bf   :  { %v405_v48 = vpop.f32.mrf.mxu1  ;;  %1318 = vmatmul.mubr.bf16.vlgmr.msra.gmra.mxu0 %v466_v43 }
 0x1c0   :  { %v406_v49 = vadd.f32 %v1127_v29, %v405_v48  ;;  %v456_v50 = vmax.f32 %v414_v46, 0.0  ;;  %1366 = vmatpush3.bf16.msra.mxu0 %v1454_v23 }
 0x1c1   :  { %v1295_v51 = vpop.f32.mrf.mxu1  ;;  %1367 = vmatprep.subr.bf16.mxu0 %v1455_v24 }
 0x1c2   :  { %v454_v53 = vmax.f32 %v406_v49, 0.0  ;;  %v427_v55 = vadd.f32 %v1295_v51, %v1127_v29  ;;  %v468_v59 = vpack.c.bf16 %v456_v50, %v455_v54 }
 0x1c3   :  { %v418_v56 = vpop.f32.mrf.mxu1 }
 0x1c4   :  { %v467_v57 = vpack.c.bf16 %v454_v53, %v453_v52  ;;  %v419_v58 = vadd.f32 %v1127_v29, %v418_v56  ;;  %v459_v62 = vmax.f32 %v427_v55, 0.0  ;;  %1368 = vmatpush3.bf16.msra.mxu0 %v1455_v24 }
 0x1c5   :  { %v1296_v60 = vpop.f32.mrf.mxu1  ;;  %1369 = vmatprep.subr.bf16.mxu0 %v1456_v25 }
 0x1c6   :  { %v430_v61 = vadd.f32 %v1296_v60, %v1127_v29  ;;  %1321 = vmatprep.mubr.bf16.mxu0 %v467_v57  ;;  %v457_v0 = vmax.f32 %v419_v58, 0.0 }
 0x1c7   :  { %v421_v63 = vpop.f32.mrf.mxu1  ;;  %1322 = vmatmul.mubr.bf16.gmra.mxu0 %v468_v59 }
 0x1c8   :  { %v460_v1 = vmax.f32 %v430_v61, 0.0  ;;  %v422_v2 = vadd.f32 %v1127_v29, %v421_v63  ;;  %1370 = vmatpush3.bf16.msra.mxu0 %v1456_v25 }
 0x1c9   :  { %v1299_v3 = vpop.f32.mrf.mxu1  ;;  %1371 = vmatprep.subr.bf16.mxu0 %v1575_v26 }
 0x1ca   :  { %v458_v4 = vmax.f32 %v422_v2, 0.0  ;;  %v470_v5 = vpack.c.bf16 %v460_v1, %v459_v62  ;;  %v443_v6 = vadd.f32 %v1299_v3, %v1127_v29 }
 0x1cb   :  { %v434_v7 = vpop.f32.mrf.mxu1 }
 0x1cc   :  { %v469_v8 = vpack.c.bf16 %v458_v4, %v457_v0  ;;  %v435_v9 = vadd.f32 %v1127_v29, %v434_v7  ;;  %v463_v12 = vmax.f32 %v443_v6, 0.0  ;;  %1372 = vmatpush3.bf16.msra.mxu0 %v1575_v26 }
 0x1cd   :  { %v1300_v10 = vpop.f32.mrf.mxu1  ;;  %1373 = vmatprep.subr.bf16.mxu0 %v1578_v27 }
 0x1ce   :  { %v446_v11 = vadd.f32 %v1300_v10, %v1127_v29  ;;  %1325 = vmatprep.mubr.bf16.mxu0 %v469_v8  ;;  %v461_v14 = vmax.f32 %v435_v9, 0.0 }
 0x1cf   :  { %v437_v13 = vpop.f32.mrf.mxu1  ;;  %1326 = vmatmul.mubr.bf16.gmra.mxu0 %v470_v5 }
 0x1d0   :  { %v464_v15 = vmax.f32 %v446_v11, 0.0  ;;  %v438_v16 = vadd.f32 %v1127_v29, %v437_v13  ;;  %1374 = vmatpush3.bf16.msra.mxu0 %v1578_v27 }
 0x1d1   :  { %1375 = vmatprep.subr.bf16.mxu0 %v1459_v21 }
 0x1d2   :  { %v462_v17 = vmax.f32 %v438_v16, 0.0  ;;  %v472_v18 = vpack.c.bf16 %v464_v15, %v463_v12 }
 0x1d4   :  { %v471_v19 = vpack.c.bf16 %v462_v17, %v461_v14  ;;  %1376 = vmatpush3.bf16.msra.mxu0 %v1459_v21 }
 0x1d5   :  { %1377 = vmatprep.subr.bf16.mxu0 %v1460_v22 }
 0x1d6   :  { %1329 = vmatprep.mubr.bf16.mxu0 %v471_v19 }
 0x1d7   :  { %1330 = vmatmul.mubr.bf16.gmra.mxu0 %v472_v18 }
 0x1d8   :  { %1378 = vmatpush3.bf16.msra.mxu0 %v1460_v22 }
 0x27f   :  { %v1319_v28 = vpop.f32.mrf.mxu0 }
 0x280   :  { %v589_v34 = vadd.f32 %v1319_v28, %v1586_v30 }
 0x281   :  { %v580_v29 = vpop.f32.mrf.mxu0 }
 0x282   :  { %v581_v32 = vadd.f32 %v1586_v30, %v580_v29  ;;  %v645_v41 = vmax.f32 %v589_v34, 0.0 }
 0x283   :  { %v1320_v31 = vpop.f32.mrf.mxu0 }
 0x284   :  { %v592_v33 = vadd.f32 %v1320_v31, %v1586_v30  ;;  %v643_v39 = vmax.f32 %v581_v32, 0.0 }
 0x285   :  { %v583_v35 = vpop.f32.mrf.mxu0 }
 0x286   :  { %v584_v36 = vadd.f32 %v1586_v30, %v583_v35  ;;  %v646_v37 = vmax.f32 %v592_v33, 0.0 }
 0x287   :  { %v1323_v38 = vpop.f32.mrf.mxu0 }
 0x288   :  { %v644_v40 = vmax.f32 %v584_v36, 0.0  ;;  %v660_v44 = vpack.c.bf16 %v646_v37, %v645_v41  ;;  %v605_v48 = vadd.f32 %v1323_v38, %v1586_v30 }
 0x289   :  { %v596_v42 = vpop.f32.mrf.mxu0 }
 0x28a   :  { %v659_v43 = vpack.c.bf16 %v644_v40, %v643_v39  ;;  %v597_v46 = vadd.f32 %v1586_v30, %v596_v42  ;;  %v649_v55 = vmax.f32 %v605_v48, 0.0 }
 0x28b   :  { %v1324_v45 = vpop.f32.mrf.mxu0 }
 0x28c   :  { %v608_v47 = vadd.f32 %v1324_v45, %v1586_v30  ;;  %1349 = vmatprep.mubr.bf16.mxu1 %v659_v43  ;;  %v647_v53 = vmax.f32 %v597_v46, 0.0 }
 0x28d   :  { %v599_v49 = vpop.f32.mrf.mxu0  ;;  %1350 = vmatmul.mubr.bf16.vlgmr.msra.gmra.mxu1 %v660_v44 }
 0x28e   :  { %v600_v50 = vadd.f32 %v1586_v30, %v599_v49  ;;  %1405 = vmatpush3.bf16.msra.mxu1 %v1454_v23  ;;  %v650_v51 = vmax.f32 %v608_v47, 0.0  ;;  %v1461_v23 = vld [vmem:[#allocation2 + $0x100] sm:$0xff]  }
 0x28f   :  { %v1327_v52 = vpop.f32.mrf.mxu0  ;;  %1398 = vmatprep.subr.bf16.mxu1 %v1455_v24  ;;  %1379 = vmatprep.subr.bf16.mxu0 %v1461_v23 }
 0x290   :  { %v648_v54 = vmax.f32 %v600_v50, 0.0  ;;  %v662_v58 = vpack.c.bf16 %v650_v51, %v649_v55  ;;  %v621_v62 = vadd.f32 %v1327_v52, %v1586_v30  ;;  %1380 = vmatpush3.bf16.msra.mxu0 %v1461_v23 }
 0x291   :  { %v612_v56 = vpop.f32.mrf.mxu0 }
 0x292   :  { %v661_v57 = vpack.c.bf16 %v648_v54, %v647_v53  ;;  %1406 = vmatpush3.bf16.msra.mxu1 %v1455_v24  ;;  %v613_v60 = vadd.f32 %v1586_v30, %v612_v56  ;;  %v653_v5 = vmax.f32 %v621_v62, 0.0 }
 0x293   :  { %v1328_v59 = vpop.f32.mrf.mxu0  ;;  %1399 = vmatprep.subr.bf16.mxu1 %v1456_v25 }
 0x294   :  { %v624_v61 = vadd.f32 %v1328_v59, %v1586_v30  ;;  %1353 = vmatprep.mubr.bf16.mxu1 %v661_v57  ;;  %v651_v3 = vmax.f32 %v613_v60, 0.0 }
 0x295   :  { %v615_v63 = vpop.f32.mrf.mxu0  ;;  %1354 = vmatmul.mubr.bf16.gmra.mxu1 %v662_v58 }
 0x296   :  { %v616_v0 = vadd.f32 %v1586_v30, %v615_v63  ;;  %1407 = vmatpush3.bf16.msra.mxu1 %v1456_v25  ;;  %v654_v1 = vmax.f32 %v624_v61, 0.0 }
 0x297   :  { %v1331_v2 = vpop.f32.mrf.mxu0  ;;  %1400 = vmatprep.subr.bf16.mxu1 %v1575_v26 }
 0x298   :  { %v652_v4 = vmax.f32 %v616_v0, 0.0  ;;  %v637_v6 = vadd.f32 %v1331_v2, %v1586_v30  ;;  %v664_v10 = vpack.c.bf16 %v654_v1, %v653_v5 }
 0x299   :  { %v628_v7 = vpop.f32.mrf.mxu0 }
 0x29a   :  { %v663_v8 = vpack.c.bf16 %v652_v4, %v651_v3  ;;  %v629_v9 = vadd.f32 %v1586_v30, %v628_v7  ;;  %1408 = vmatpush3.bf16.msra.mxu1 %v1575_v26  ;;  %v657_v13 = vmax.f32 %v637_v6, 0.0  ;;  %v1147_v26 = vld [vmem:[%s1621_s2 + $0x3] ss:$0 sm:$0xff] }
 0x29b   :  { %v1332_v11 = vpop.f32.mrf.mxu0  ;;  %1401 = vmatprep.subr.bf16.mxu1 %v1578_v27 }
 0x29c   :  { %v640_v12 = vadd.f32 %v1332_v11, %v1586_v30  ;;  %1357 = vmatprep.mubr.bf16.mxu1 %v663_v8  ;;  %v655_v15 = vmax.f32 %v629_v9, 0.0 }
 0x29d   :  { %v631_v14 = vpop.f32.mrf.mxu0  ;;  %1358 = vmatmul.mubr.bf16.gmra.mxu1 %v664_v10 }
 0x29e   :  { %v658_v16 = vmax.f32 %v640_v12, 0.0  ;;  %v632_v17 = vadd.f32 %v1586_v30, %v631_v14  ;;  %1409 = vmatpush3.bf16.msra.mxu1 %v1578_v27 }
 0x29f   :  { %1402 = vmatprep.subr.bf16.mxu1 %v1459_v21 }
 0x2a0   :  { %v656_v18 = vmax.f32 %v632_v17, 0.0  ;;  %v666_v19 = vpack.c.bf16 %v658_v16, %v657_v13 }
 0x2a2   :  { %v665_v20 = vpack.c.bf16 %v656_v18, %v655_v15  ;;  %1410 = vmatpush3.bf16.msra.mxu1 %v1459_v21  ;;  %v1157_v18 = vld [vmem:[%s1621_s2 + $0x4] ss:$0 sm:$0xff]  ;;  %s1513_s2 = smov [#allocation5]  }
 0x2a3   :  { %1403 = vmatprep.subr.bf16.mxu1 %v1460_v22  ;;  %s1095_s16 = sshll.u32 %s1513_s2, 4  ;;  %s1096_s16 = int_to_ptr.vmem [resolvable:$true] %s1095_s16 }
 0x2a4   :  { %1361 = vmatprep.mubr.bf16.mxu1 %v665_v20  ;;  %s1486_s17 = scalar_lea.vmem %s1096_s16, 128  ;;  %p1491_p6 = scmp.lt.s32.totalorder %s1096_s16, %s1096_s16 }
 0x2a5   :  { %1362 = vmatmul.mubr.bf16.gmra.mxu1 %v666_v19  ;;  %p1487_p5 = scmp.ne.s32.totalorder %s1096_s16, %s1486_s17  ;;  %p1492_p7 = scmp.lt.s32.totalorder %s1486_s17, %s1486_s17 }
 0x2a6   :  { %1411 = vmatpush3.bf16.msra.mxu1 %v1460_v22 }
 0x2a7   :  { %1404 = vmatprep.subr.bf16.mxu1 %v1461_v23  ;;  %p1493_p8 = por %p1492_p7, %p1491_p6 }
 0x2a9   :  { %p1494_p9 = pnand %p1493_p8, %p1487_p5 }
 0x2aa   :  { %1412 = vmatpush3.bf16.msra.mxu1 %v1461_v23 }
 0x34d   :  { %v1351_v24 = vpop.f32.mrf.mxu1 }
 0x34e   :  { %v783_v30 = vadd.f32 %v1351_v24, %v1147_v26 }
 0x34f   :  { %v774_v25 = vpop.f32.mrf.mxu1 }
 0x350   :  { %v775_v28 = vadd.f32 %v1147_v26, %v774_v25  ;;  %v839_v37 = vmax.f32 %v783_v30, 0.0 }
 0x351   :  { %v1352_v27 = vpop.f32.mrf.mxu1 }
 0x352   :  { %v786_v29 = vadd.f32 %v1352_v27, %v1147_v26  ;;  %v837_v35 = vmax.f32 %v775_v28, 0.0 }
 0x353   :  { %v777_v31 = vpop.f32.mrf.mxu1 }
 0x354   :  { %v778_v32 = vadd.f32 %v1147_v26, %v777_v31  ;;  %v840_v33 = vmax.f32 %v786_v29, 0.0 }
 0x355   :  { %v1355_v34 = vpop.f32.mrf.mxu1 }
 0x356   :  { %v838_v36 = vmax.f32 %v778_v32, 0.0  ;;  %v854_v40 = vpack.c.bf16 %v840_v33, %v839_v37  ;;  %v799_v44 = vadd.f32 %v1355_v34, %v1147_v26 }
 0x357   :  { %v790_v38 = vpop.f32.mrf.mxu1 }
 0x358   :  { %v853_v39 = vpack.c.bf16 %v838_v36, %v837_v35  ;;  %v791_v42 = vadd.f32 %v1147_v26, %v790_v38  ;;  %v843_v51 = vmax.f32 %v799_v44, 0.0 }
 0x359   :  { %v1356_v41 = vpop.f32.mrf.mxu1 }
 0x35a   :  { %v802_v43 = vadd.f32 %v1356_v41, %v1147_v26  ;;  %1381 = vmatprep.mubr.bf16.mxu0 %v853_v39  ;;  %v841_v49 = vmax.f32 %v791_v42, 0.0 }
 0x35b   :  { %v793_v45 = vpop.f32.mrf.mxu1  ;;  %1382 = vmatmul.mubr.bf16.vlgmr.msra.gmra.mxu0 %v854_v40 }
 0x35c   :  { %v794_v46 = vadd.f32 %v1147_v26, %v793_v45  ;;  %v844_v47 = vmax.f32 %v802_v43, 0.0 }
 0x35d   :  { %v1359_v48 = vpop.f32.mrf.mxu1 }
 0x35e   :  { %v842_v50 = vmax.f32 %v794_v46, 0.0  ;;  %v856_v54 = vpack.c.bf16 %v844_v47, %v843_v51  ;;  %v815_v58 = vadd.f32 %v1359_v48, %v1147_v26 }
 0x35f   :  { %v806_v52 = vpop.f32.mrf.mxu1 }
 0x360   :  { %v855_v53 = vpack.c.bf16 %v842_v50, %v841_v49  ;;  %v807_v56 = vadd.f32 %v1147_v26, %v806_v52  ;;  %v847_v1 = vmax.f32 %v815_v58, 0.0  ;;  %v1063_v50 = vlaneseq }
 0x361   :  { %v1360_v55 = vpop.f32.mrf.mxu1 }
 0x362   :  { %v818_v57 = vadd.f32 %v1360_v55, %v1147_v26  ;;  %1385 = vmatprep.mubr.bf16.mxu0 %v855_v53  ;;  %v845_v63 = vmax.f32 %v807_v56, 0.0  ;;  %v1064_v51 = vshrl.u32 %v1063_v50, 7 }
 0x363   :  { %v809_v59 = vpop.f32.mrf.mxu1  ;;  %1386 = vmatmul.mubr.bf16.gmra.mxu0 %v856_v54 }
 0x364   :  { %v810_v60 = vadd.f32 %v1147_v26, %v809_v59  ;;  %v848_v61 = vmax.f32 %v818_v57, 0.0  ;;  %vm1065_vm1 = vcmp.lt.s32.totalorder %v1064_v51, 6  ;;  %vm1085_vm2 = vcmp.eq.s32.totalorder %v1064_v51, 6 }
 0x365   :  { %v1363_v62 = vpop.f32.mrf.mxu1 }
 0x366   :  { %v846_v0 = vmax.f32 %v810_v60, 0.0  ;;  %v858_v4 = vpack.c.bf16 %v848_v61, %v847_v1  ;;  %v831_v5 = vadd.f32 %v1363_v62, %v1147_v26 }
 0x367   :  { %v822_v2 = vpop.f32.mrf.mxu1 }
 0x368   :  { %v857_v3 = vpack.c.bf16 %v846_v0, %v845_v63  ;;  %v823_v7 = vadd.f32 %v1147_v26, %v822_v2  ;;  %v851_v11 = vmax.f32 %v831_v5, 0.0 }
 0x369   :  { %v1364_v6 = vpop.f32.mrf.mxu1 }
 0x36a   :  { %v834_v8 = vadd.f32 %v1364_v6, %v1147_v26  ;;  %1389 = vmatprep.mubr.bf16.mxu0 %v857_v3  ;;  %v849_v13 = vmax.f32 %v823_v7, 0.0 }
 0x36b   :  { %v825_v9 = vpop.f32.mrf.mxu1  ;;  %1390 = vmatmul.mubr.bf16.gmra.mxu0 %v858_v4 }
 0x36c   :  { %v826_v10 = vadd.f32 %v1147_v26, %v825_v9  ;;  %v852_v12 = vmax.f32 %v834_v8, 0.0 }
 0x36e   :  { %v850_v14 = vmax.f32 %v826_v10, 0.0  ;;  %v860_v16 = vpack.c.bf16 %v852_v12, %v851_v11 }
 0x370   :  { %v859_v15 = vpack.c.bf16 %v850_v14, %v849_v13 }
 0x372   :  { %1393 = vmatprep.mubr.bf16.mxu1 %v859_v15 }
 0x373   :  { %1394 = vmatmul.mubr.bf16.vlgmr.msra.gmra.mxu1 %v860_v16 }
 0x41b   :  { %v1383_v17 = vpop.f32.mrf.mxu0 }
 0x41c   :  { %v977_v25 = vadd.f32 %v1383_v17, %v1157_v18 }
 0x41d   :  { %v968_v19 = vpop.f32.mrf.mxu0 }
 0x41e   :  { %v969_v20 = vadd.f32 %v1157_v18, %v968_v19 }
 0x41f   :  { %v1384_v21 = vpop.f32.mrf.mxu0 }
 0x420   :  { %1031 = vxpose.xlu0.b32.start [1/16] (narrow) %v969_v20, 8  ;;  %v980_v27 = vadd.f32 %v1384_v21, %v1157_v18 }
 0x421   :  { %v971_v22 = vpop.f32.mrf.mxu0 }
 0x422   :  { %v972_v23 = vadd.f32 %v1157_v18, %v971_v22 }
 0x423   :  { %v1387_v24 = vpop.f32.mrf.mxu0 }
 0x424   :  { %1032 = vxpose.xlu0.b32.cont [2/16] (narrow) %v972_v23, 8  ;;  %v993_v33 = vadd.f32 %v1387_v24, %v1157_v18 }
 0x425   :  { %v984_v26 = vpop.f32.mrf.mxu0 }
 0x426   :  { %v985_v29 = vadd.f32 %v1157_v18, %v984_v26 }
 0x427   :  { %v1388_v28 = vpop.f32.mrf.mxu0 }
 0x428   :  { %1033 = vxpose.xlu0.b32.cont [3/16] (narrow) %v977_v25, 8  ;;  %v996_v35 = vadd.f32 %v1388_v28, %v1157_v18 }
 0x429   :  { %v987_v30 = vpop.f32.mrf.mxu0 }
 0x42a   :  { %v988_v31 = vadd.f32 %v1157_v18, %v987_v30 }
 0x42b   :  { %v1391_v32 = vpop.f32.mrf.mxu0 }
 0x42c   :  { %1034 = vxpose.xlu0.b32.cont [4/16] (narrow) %v980_v27, 8  ;;  %v1009_v41 = vadd.f32 %v1391_v32, %v1157_v18 }
 0x42d   :  { %v1000_v34 = vpop.f32.mrf.mxu0 }
 0x42e   :  { %v1001_v37 = vadd.f32 %v1157_v18, %v1000_v34 }
 0x42f   :  { %v1392_v36 = vpop.f32.mrf.mxu0 }
 0x430   :  { %1035 = vxpose.xlu0.b32.cont [5/16] (narrow) %v985_v29, 8  ;;  %v1012_v43 = vadd.f32 %v1392_v36, %v1157_v18 }
 0x431   :  { %v1003_v38 = vpop.f32.mrf.mxu0 }
 0x432   :  { %v1004_v39 = vadd.f32 %v1157_v18, %v1003_v38 }
 0x433   :  { %v1395_v40 = vpop.f32.mrf.mxu1 }
 0x434   :  { %1036 = vxpose.xlu0.b32.cont [6/16] (narrow) %v988_v31, 8  ;;  %v1025_v48 = vadd.f32 %v1395_v40, %v1157_v18 }
 0x435   :  { %v1016_v42 = vpop.f32.mrf.mxu1 }
 0x436   :  { %v1017_v45 = vadd.f32 %v1157_v18, %v1016_v42 }
 0x437   :  { %v1396_v44 = vpop.f32.mrf.mxu1 }
 0x438   :  { %1037 = vxpose.xlu0.b32.cont [7/16] (narrow) %v993_v33, 8  ;;  %v1028_v49 = vadd.f32 %v1396_v44, %v1157_v18 }
 0x439   :  { %v1019_v46 = vpop.f32.mrf.mxu1 }
 0x43a   :  { %v1020_v47 = vadd.f32 %v1157_v18, %v1019_v46 }
 0x43c   :  { %1038 = vxpose.xlu0.b32.cont [8/16] (narrow) %v996_v35, 8 }
 0x440   :  { %1039 = vxpose.xlu0.b32.cont [9/16] (narrow) %v1001_v37, 8 }
 0x444   :  { %1040 = vxpose.xlu0.b32.cont [10/16] (narrow) %v1004_v39, 8 }
 0x448   :  { %1041 = vxpose.xlu0.b32.cont [11/16] (narrow) %v1009_v41, 8 }
 0x44c   :  { %1042 = vxpose.xlu0.b32.cont [12/16] (narrow) %v1012_v43, 8 }
 0x450   :  { %1043 = vxpose.xlu0.b32.cont [13/16] (narrow) %v1017_v45, 8 }
 0x454   :  { %1044 = vxpose.xlu0.b32.cont [14/16] (narrow) %v1020_v47, 8 }
 0x458   :  { %1045 = vxpose.xlu0.b32.cont [15/16] (narrow) %v1025_v48, 8 }
 0x45c   :  { %1046 = vxpose.xlu0.b32.end [16/16] (narrow) %v1028_v49, 8 }
 0x49c   :  { %v1047_v52 = vpop.trf.xlu0 }
 0x49d   :  { %v1066_v53 = vsel %vm1065_vm1, %v1047_v52, -1e+30  ;;  %v1084_v5 = vmax.f32 %v1047_v52, 0.0 }
 0x49e   :  { %v1067_v54 = vrot.slane %v1066_v53, 4 }
 0x49f   :  { %v1086_v8 = vsel %vm1085_vm2, %v1084_v5, 0.0 }
 0x4a0   :  { %v1068_v55 = vmax.f32 %v1066_v53, %v1067_v54 }
 0x4a2   :  { %v1069_v56 = vrot.slane %v1068_v55, 2 }
 0x4a4   :  { %v1070_v57 = vmax.f32 %v1068_v55, %v1069_v56 }
 0x4a6   :  { %v1071_v58 = vrot.slane %v1070_v57, 1 }
 0x4a8   :  { %v1072_v59 = vmax.f32 %v1070_v57, %v1071_v58 }
 0x4aa   :  { %v1073_v60 = vsub.f32 %v1066_v53, %v1072_v59 }
 0x4ac   :  { %v1074_v61 = vmul.f32 1.442695, %v1073_v60 }
 0x4ae   :  { %1462 = vpow2.f32 %v1074_v61 }
 0x4bb   :  { %v1463_v62 = vpop.eup %1462 }
 0x4bc   :  { %v1076_v63 = vrot.slane %v1463_v62, 4 }
 0x4be   :  { %v1077_v0 = vadd.f32 %v1463_v62, %v1076_v63 }
 0x4c0   :  { %v1078_v1 = vrot.slane %v1077_v0, 2 }
 0x4c2   :  { %v1079_v2 = vadd.f32 %v1078_v1, %v1077_v0 }
 0x4c4   :  { %v1080_v3 = vrot.slane %v1079_v2, 1 }
 0x4c6   :  { %v1081_v4 = vadd.f32 %v1080_v3, %v1079_v2 }
 0x4c8   :  { %1464 = vrcp.f32 %v1081_v4 }
 0x4d5   :  { %v1465_v6 = vpop.eup %1464 }
 0x4d6   :  { %v1083_v7 = vmul.f32 %v1465_v6, %v1463_v62 }
 0x4d8   :  { %v1087_v9 = vsel %vm1065_vm1, %v1083_v7, %v1086_v8 }
 0x4d9   :  { %1088 = vst [vmem:[#allocation5] sm:$0xff] %v1087_v9 }
 0x4da   :  { %1497 = shalt.err (!%p1494_p9)
}
 0x4db   :  { %1098 = dma.vmem_to_hbm [thread:$0]  %s1096_s16, 128, %s1622_s3, [#allocation4]  }
 0x4dc   :  { %1508 = dma.done.wait [#allocation4], 128  }
 0x4dd   :  { %1509 = vsyncadd [#allocation4], 4294967168 }
 0x4de   :  { %1102 = vsyncpa [#allocation3], 1 }
 0x4df   :  { %1103 = vsyncpa [#allocation4], 1 }

</bundles_post_ra>
